<compile_context>
chip_gen: v7x
topology: tpu7x:2x2x1
jax: 0.10.0
libtpu: 0.0.40
codegen_flags: <defaults>
</compile_context>

<pallas_src>
import jax
import jax.numpy as jnp
from jax import lax
from jax.experimental import pallas as pl
from jax.experimental.pallas import tpu as pltpu

INPUT_SIZE = 28 * 28          # 784
HIDDEN_SIZE = 5
OUT_SIZE = 1
DEFAULT_BLOCK_ROWS = 2048     # rows of x per grid step
X_PIPELINE_DEPTH = 3          # buffering depth for the streamed x tiles

_LANE = 128
_SUBLANE = 8

# dot_general dims for A @ B.T (contract both operands' last dim). Used both for
# layer 1 (PyTorch-native weight layout) and for layer 2 (puts the batch on the
# lane axis of the result so output stores are full-lane, unmasked vsts).
_TRANS_B_DIMS = (((1,), (1,)), ((), ()))


def _mlp_kernel(x_ref, w1_ref, b1_ref, w2_ref, b2_ref, o_ref):
    # layer 1: (TM, 784) x (5, 784)^T -> (TM, 5); MXU with f32 accumulation.
    h = lax.dot_general(x_ref[...], w1_ref[...], _TRANS_B_DIMS,
                        preferred_element_type=jnp.float32)
    h = jnp.maximum(h + b1_ref[...].astype(jnp.float32), 0.0)    # bias + relu (VPU)
    # layer 2 with batch on lanes: (1, 5) x (TM, 5)^T -> (1, TM), lane-dense.
    z = lax.dot_general(w2_ref[...].astype(jnp.float32), h, _TRANS_B_DIMS,
                        preferred_element_type=jnp.float32)
    z = z + b2_ref[0]                                             # scalar bias (SMEM)
    o_ref[...] = jax.nn.sigmoid(z).astype(o_ref.dtype)


def _round_up(v, m):
    return ((v + m - 1) // m) * m


def _pick_tile(batch, block_rows):
    """tm must equal the full batch or be a multiple of 128 (lane-dense (1, tm)
    output block; sublane-aligned (tm, 784) x block)."""
    if block_rows >= batch:
        return batch
    tm = max(_LANE, (block_rows // _LANE) * _LANE)
    return min(tm, batch)


def _vmem_limit_bytes(tm, x_itemsize, x_buffers):
    """Explicit scoped-VMEM budget using lane-padded sizes (784 pads to 896)."""
    lanes = _round_up(INPUT_SIZE, _LANE)              # 896
    rows = _round_up(tm, _SUBLANE)
    x_bytes = rows * lanes * x_itemsize * x_buffers   # streamed x tiles
    # resident weights/biases (~tens of KiB padded), double-buffered (1, tm)
    # output, plus fixed headroom for compiler scratch.
    misc = 4 * _SUBLANE * lanes * 4 + 2 * _SUBLANE * max(tm, _LANE) * 4 + (2 << 20)
    # Floor at 32 MiB (>= every generation's scoped default); cap at 56 MiB so
    # the budget still fits v7x's 64 MiB physical VMEM per TensorCore.
    return max(32 << 20, min(56 << 20, x_bytes + misc))


def neural_net2_forward(x, w1, b1, w2, b2, *, block_rows=DEFAULT_BLOCK_ROWS):
    """Forward pass of NeuralNet2.

    x  : (B, 784)  activations (f32 or bf16 -- bf16 halves the dominant HBM traffic)
    w1 : (5, 784)  linear1 weight, PyTorch-native (out_features, in_features)
    b1 : (1, 5)    linear1 bias
    w2 : (1, 5)    linear2 weight, PyTorch-native
    b2 : (1,)      linear2 bias (scalar, placed in SMEM)
    returns (B, 1) float32 (same shape/semantics as the torch module's output).
    """
    B = x.shape[0]
    assert x.shape == (B, INPUT_SIZE)
    assert w1.shape == (HIDDEN_SIZE, INPUT_SIZE)
    assert w1.dtype == x.dtype, "layer-1 MXU operands must share a dtype"

    tm = _pick_tile(B, block_rows)
    num_tiles = pl.cdiv(B, tm)

    # x streams through pipelined tiles; deeper buffering only when the grid is
    # long enough to benefit from it.
    if num_tiles >= X_PIPELINE_DEPTH:
        x_buffers = X_PIPELINE_DEPTH
        x_spec = pl.BlockSpec((tm, INPUT_SIZE), lambda i: (i, 0),
                              pipeline_mode=pl.Buffered(X_PIPELINE_DEPTH))
    else:
        x_buffers = 2
        x_spec = pl.BlockSpec((tm, INPUT_SIZE), lambda i: (i, 0))

    flops = 2 * B * INPUT_SIZE * HIDDEN_SIZE + 2 * B * HIDDEN_SIZE * OUT_SIZE
    bytes_accessed = (x.size * x.dtype.itemsize
                      + w1.size * w1.dtype.itemsize
                      + b1.size * b1.dtype.itemsize
                      + w2.size * w2.dtype.itemsize
                      + b2.size * b2.dtype.itemsize
                      + B * OUT_SIZE * 4)

    out_row = pl.pallas_call(
        _mlp_kernel,
        out_shape=jax.ShapeDtypeStruct((1, B), jnp.float32),
        grid=(num_tiles,),
        in_specs=[
            x_spec,
            # weights / b1: constant index maps -> fetched once, stay resident
            pl.BlockSpec((HIDDEN_SIZE, INPUT_SIZE), lambda i: (0, 0)),
            pl.BlockSpec((1, HIDDEN_SIZE), lambda i: (0, 0)),
            pl.BlockSpec((OUT_SIZE, HIDDEN_SIZE), lambda i: (0, 0)),
            # b2: scalar in SMEM
            pl.BlockSpec(memory_space=pltpu.MemorySpace.SMEM),
        ],
        # lane-dense output: batch on the lane axis, blocked along lanes
        out_specs=pl.BlockSpec((1, tm), lambda i: (0, i)),
        compiler_params=pltpu.CompilerParams(
            dimension_semantics=("parallel",),   # independent row tiles -> megacore
            vmem_limit_bytes=_vmem_limit_bytes(tm, x.dtype.itemsize, x_buffers),
        ),
        cost_estimate=pl.CostEstimate(
            flops=flops, transcendentals=B, bytes_accessed=bytes_accessed),
    )(x, w1, b1, w2, b2)
    return out_row.reshape(B, OUT_SIZE)


def init_params(key):
    """Deterministic init mimicking nn.Linear defaults (uniform +/- 1/sqrt(fan_in))."""
    k1, k2, k3, k4 = jax.random.split(key, 4)
    lim1 = 1.0 / jnp.sqrt(INPUT_SIZE)
    lim2 = 1.0 / jnp.sqrt(HIDDEN_SIZE)
    w1 = jax.random.uniform(k1, (HIDDEN_SIZE, INPUT_SIZE), jnp.float32, -lim1, lim1)
    b1 = jax.random.uniform(k2, (1, HIDDEN_SIZE), jnp.float32, -lim1, lim1)
    w2 = jax.random.uniform(k3, (OUT_SIZE, HIDDEN_SIZE), jnp.float32, -lim2, lim2)
    b2 = jax.random.uniform(k4, (OUT_SIZE,), jnp.float32, -lim2, lim2)
    return w1, b1, w2, b2


def _reference(x, w1, b1, w2, b2):
    h = jnp.maximum(x.astype(jnp.float32) @ w1.astype(jnp.float32).T + b1, 0.0)
    return jax.nn.sigmoid(h @ w2.T + b2)


if __name__ == "__main__":
    key = jax.random.PRNGKey(0)
    kx, kx2, kp = jax.random.split(key, 3)
    w1, b1, w2, b2 = init_params(kp)

    # 1) small single-tile batch, f32 (exact match with the reference)
    batch = 8
    x = jax.random.normal(kx, (batch, INPUT_SIZE), dtype=jnp.float32)
    out = jax.block_until_ready(neural_net2_forward(x, w1, b1, w2, b2))
    ref = _reference(x, w1, b1, w2, b2)
    assert out.shape == (batch, OUT_SIZE)
    assert jnp.allclose(out, ref, atol=1e-5, rtol=1e-5)

    # 2) multi-tile path with a partial tail block (exercises Buffered(3)
    #    pipelining, (8,128)-aligned tiles and masked tail stores)
    batch2 = 300
    x2 = jax.random.normal(kx2, (batch2, INPUT_SIZE), dtype=jnp.float32)
    out2 = jax.block_until_ready(
        neural_net2_forward(x2, w1, b1, w2, b2, block_rows=128))
    ref2 = _reference(x2, w1, b1, w2, b2)
    assert out2.shape == (batch2, OUT_SIZE)
    assert jnp.allclose(out2, ref2, atol=1e-5, rtol=1e-5)

    # 3) bf16 activations/weights: halves the dominant HBM traffic (x), f32 accum
    out3 = jax.block_until_ready(
        neural_net2_forward(x2.astype(jnp.bfloat16), w1.astype(jnp.bfloat16),
                            b1, w2, b2, block_rows=128))
    assert out3.shape == (batch2, OUT_SIZE)
    assert jnp.allclose(out3, ref2, atol=3e-2, rtol=3e-2)

    print("KERNEL_OK")
</pallas_src>

<mosaic_0001>
module attributes {stable_mosaic.version = 11 : i64} {
  func.func @_mlp_kernel(%arg0: i32, %arg1: memref<8x784xf32, #tpu.memory_space<vmem>>, %arg2: memref<5x784xf32, #tpu.memory_space<vmem>>, %arg3: memref<1x5xf32, #tpu.memory_space<vmem>>, %arg4: memref<1x5xf32, #tpu.memory_space<vmem>>, %arg5: memref<1xf32, #tpu.memory_space<smem>>, %arg6: memref<1x8xf32, #tpu.memory_space<vmem>>) attributes {dimension_semantics = [#tpu.dimension_semantics<parallel>], iteration_bounds = array<i64: 1>, scalar_prefetch = 0 : i64, scratch_operands = 0 : i64, tpu.core_type = #tpu.core_type<tc>, window_params = [{transform_indices = @transform_0, window_bounds = array<i64: 8, 784>}, {pipeline_mode = #tpu.pipeline_mode<synchronous>, transform_indices = @transform_1, window_bounds = array<i64: 5, 784>}, {pipeline_mode = #tpu.pipeline_mode<synchronous>, transform_indices = @transform_2, window_bounds = array<i64: 1, 5>}, {pipeline_mode = #tpu.pipeline_mode<synchronous>, transform_indices = @transform_3, window_bounds = array<i64: 1, 5>}, {transform_indices = @transform_4, window_bounds = array<i64: 1>}, {transform_indices = @transform_5, window_bounds = array<i64: 1, 8>}]} {
    %c0 = arith.constant 0 : index
    %c0_0 = arith.constant 0 : index
    %0 = vector.load %arg1[%c0, %c0_0] : memref<8x784xf32, #tpu.memory_space<vmem>>, vector<8x784xf32>
    %c0_1 = arith.constant 0 : index
    %c0_2 = arith.constant 0 : index
    %1 = vector.load %arg2[%c0_1, %c0_2] : memref<5x784xf32, #tpu.memory_space<vmem>>, vector<5x784xf32>
    %cst = arith.constant dense<0.000000e+00> : vector<8x5xf32>
    %2 = tpu.matmul %0, %1, %cst {dimension_numbers = #tpu.dot_dimension_numbers<[1], [1], [0], [0], [0, 0, 1, 0], [], []>} : vector<8x784xf32>, vector<5x784xf32>, vector<8x5xf32> -> vector<8x5xf32>
    %c0_3 = arith.constant 0 : index
    %c0_4 = arith.constant 0 : index
    %3 = vector.load %arg3[%c0_3, %c0_4] : memref<1x5xf32, #tpu.memory_space<vmem>>, vector<1x5xf32>
    %4 = vector.broadcast %3 : vector<1x5xf32> to vector<8x5xf32>
    %5 = arith.addf %2, %4 : vector<8x5xf32>
    %cst_5 = arith.constant 0.000000e+00 : f32
    %6 = vector.broadcast %cst_5 : f32 to vector<8x5xf32>
    %7 = arith.maximumf %5, %6 : vector<8x5xf32>
    %c0_6 = arith.constant 0 : index
    %c0_7 = arith.constant 0 : index
    %8 = vector.load %arg4[%c0_6, %c0_7] : memref<1x5xf32, #tpu.memory_space<vmem>>, vector<1x5xf32>
    %cst_8 = arith.constant dense<0.000000e+00> : vector<1x8xf32>
    %9 = tpu.matmul %8, %7, %cst_8 {dimension_numbers = #tpu.dot_dimension_numbers<[1], [1], [0], [0], [0, 0, 1, 0], [], []>} : vector<1x5xf32>, vector<8x5xf32>, vector<1x8xf32> -> vector<1x8xf32>
    %c0_9 = arith.constant 0 : index
    %10 = memref.load %arg5[%c0_9] : memref<1xf32, #tpu.memory_space<smem>>
    %11 = vector.broadcast %10 : f32 to vector<1x8xf32>
    %12 = arith.addf %9, %11 : vector<1x8xf32>
    %13 = arith.negf %12 : vector<1x8xf32>
    %14 = math.exp %13 : vector<1x8xf32>
    %cst_10 = arith.constant 1.000000e+00 : f32
    %15 = vector.broadcast %cst_10 : f32 to vector<1x8xf32>
    %16 = arith.addf %15, %14 : vector<1x8xf32>
    %17 = arith.divf %15, %16 : vector<1x8xf32>
    %c0_11 = arith.constant 0 : index
    %c0_12 = arith.constant 0 : index
    %18 = vector.load %arg6[%c0_11, %c0_12] : memref<1x8xf32, #tpu.memory_space<vmem>>, vector<1x8xf32>
    tpu.vector_store %arg6[%c0_11, %c0_12], %17 {strides = array<i32>} : memref<1x8xf32, #tpu.memory_space<vmem>>, vector<1x8xf32>,
    return
  }
  func.func @transform_0(%arg0: i32) -> (i32, i32) {
    %c0_i32 = arith.constant 0 : i32
    %c0_i32_0 = arith.constant 0 : i32
    return %arg0, %c0_i32 : i32, i32
  }
  func.func @transform_1(%arg0: i32) -> (i32, i32) {
    %c0_i32 = arith.constant 0 : i32
    %c0_i32_0 = arith.constant 0 : i32
    %c0_i32_1 = arith.constant 0 : i32
    return %c0_i32, %c0_i32_0 : i32, i32
  }
  func.func @transform_2(%arg0: i32) -> (i32, i32) {
    %c0_i32 = arith.constant 0 : i32
    %c0_i32_0 = arith.constant 0 : i32
    %c0_i32_1 = arith.constant 0 : i32
    return %c0_i32, %c0_i32_0 : i32, i32
  }
  func.func @transform_3(%arg0: i32) -> (i32, i32) {
    %c0_i32 = arith.constant 0 : i32
    %c0_i32_0 = arith.constant 0 : i32
    %c0_i32_1 = arith.constant 0 : i32
    return %c0_i32, %c0_i32_0 : i32, i32
  }
  func.func @transform_4(%arg0: i32) -> i32 {
    %c0_i32 = arith.constant 0 : i32
    %c0_i32_0 = arith.constant 0 : i32
    return %c0_i32 : i32
  }
  func.func @transform_5(%arg0: i32) -> (i32, i32) {
    %c0_i32 = arith.constant 0 : i32
    %c0_i32_0 = arith.constant 0 : i32
    return %c0_i32, %arg0 : i32, i32
  }
}

</mosaic_0001>

<bundles_post_ra>
// kernel: tpu_custom_call.1
= control target key start
LH: loop header
LB: loop body
LE: loop exit
PB: predicated region body
PF: predicated region fallthrough
CT: control target
= control target key end

     0   :  { %11 = vsyncpa [#allocation4], 0  ;;  %s646_s0 = inlined_call_operand.hbm [shape: f32[8,784], index: 0, kind: input, shape index: {}]   ;;  %s647_s1 = inlined_call_operand.hbm [shape: f32[5,784], index: 1, kind: input, shape index: {}]   ;;  %s648_s2 = inlined_call_operand.vmem [shape: f32[1,5], index: 2, kind: input, shape index: {}]   ;;  %s649_s3 = inlined_call_operand.vmem [shape: f32[1,5], index: 3, kind: input, shape index: {}]   ;;  %s650_s4 = inlined_call_operand.<no memory space> [shape: f32[1], index: 4, kind: input, shape index: {}]   ;;  %s651_s5 = inlined_call_operand.hbm [shape: f32[1,8], index: 5, kind: output, shape index: {}]  }
   0x1   :  { %12 = vsyncpa [#allocation7], 0 }
   0x2   :  { %13 = vsyncpa [#allocation5], 0  ;;  %s566_s18 = smov [#allocation3]   ;;  %s567_s20 = smov [#allocation6]  }
   0x3   :  { %s20_s19 = sshll.u32 %s566_s18, 4  ;;  %s30_s21 = sshll.u32 %s567_s20, 4  ;;  %s21_s19 = int_to_ptr.vmem [resolvable:$true] %s20_s19  ;;  %s31_s21 = int_to_ptr.vmem [resolvable:$true] %s30_s21 }
   0x4   :  { %s494_s24 = scalar_lea.hbm %s646_s0, 896 }
   0x5   :  { %p495_p0 = scmp.ne.s32.totalorder %s646_s0, %s494_s24  ;;  %p498_p1 = scmp.lt.u32.totalorder %s494_s24, %s646_s0 }
   0x7   :  { %p500_p2 = pnand %p498_p1, %p495_p0 }
   0x9   :  { %503 = shalt.err (!%p500_p2)
}
   0xa   :  { %s504_s29 = scalar_lea.vmem %s21_s19, 896  ;;  %p509_p4 = scmp.lt.s32.totalorder %s21_s19, %s21_s19 }
   0xb   :  { %p505_p3 = scmp.ne.s32.totalorder %s21_s19, %s504_s29  ;;  %p510_p5 = scmp.lt.s32.totalorder %s504_s29, %s504_s29 }
   0xd   :  { %p511_p6 = por %p510_p5, %p509_p4 }
   0xf   :  { %p512_p7 = pnand %p511_p6, %p505_p3 }
  0x11   :  { %515 = shalt.err (!%p512_p7)
}
  0x12   :  { %23 = dma.hbm_to_vmem [thread:$0]  %s646_s0, 896, %s21_s19, [#allocation4]  }
  0x13   :  { %s516_s9 = scalar_lea.hbm %s647_s1, 896 }
  0x14   :  { %p517_p8 = scmp.ne.s32.totalorder %s647_s1, %s516_s9  ;;  %p520_p9 = scmp.lt.u32.totalorder %s516_s9, %s647_s1 }
  0x16   :  { %p522_p10 = pnand %p520_p9, %p517_p8 }
  0x18   :  { %525 = shalt.err (!%p522_p10)
}
  0x19   :  { %s526_s14 = scalar_lea.vmem %s31_s21, 896  ;;  %p531_p12 = scmp.lt.s32.totalorder %s31_s21, %s31_s21 }
  0x1a   :  { %p527_p11 = scmp.ne.s32.totalorder %s31_s21, %s526_s14  ;;  %p532_p13 = scmp.lt.s32.totalorder %s526_s14, %s526_s14 }
  0x1c   :  { %p533_p0 = por %p532_p13, %p531_p12 }
  0x1e   :  { %p534_p1 = pnand %p533_p0, %p527_p11 }
  0x20   :  { %537 = shalt.err (!%p534_p1)
}
  0x21   :  { %33 = dma.hbm_to_vmem [thread:$0]  %s647_s1, 896, %s31_s21, [#allocation7]  }
  0x22   :  { %560 = dma.done.wait [#allocation4], 896  }
  0x23   :  { %561 = vsyncadd [#allocation4], 4294966400 }
  0x24   :  { %562 = dma.done.wait [#allocation7], 896  }
  0x25   :  { %563 = vsyncadd [#allocation7], 4294966400  ;;  %v56_v0 = vld [vmem:[#allocation6 + $0x18] sm:$0x1f]  ;;  %v55_v1 = vld [vmem:[#allocation6 + $0x10] sm:$0x1f]  ;;  %v357_v24 = vstv %s650_s4 }
  0x26   :  { %v49_v2 = vld [vmem:[#allocation3 + $0x18] sm:$0xff]  ;;  %144 = vmatprep.subr.mxu0 %v56_v0  ;;  %v58_v3 = vld [vmem:[#allocation6 + $0x28] sm:$0x1f]  ;;  %v48_v4 = vld [vmem:[#allocation3 + $0x10] sm:$0xff]  ;;  %v568_v11 = vmov 0.0   ;;  %vm569_vm0 = vmmov 0  }
  0x27   :  { %208 = vmatprep.mubr.f32.mxu0 %v49_v2  ;;  %145 = vmatpush1.xpose.msra.mxu0 %v55_v1  ;;  %v57_v5 = vld [vmem:[#allocation6 + $0x20] sm:$0x1f]  ;;  %v54_v6 = vld [vmem:[#allocation6 + $0x8] sm:$0x1f]  ;;  %v51_v7 = vld [vmem:[#allocation3 + $0x28] sm:$0xff]  ;;  %vm67_vm1 = vcmask 130048  }
  0x28   :  { %214 = vmatprep.subr.mxu0 %v58_v3  ;;  %74 = vmatprep.subr.mxu1 %v54_v6  ;;  %v53_v8 = vld [vmem:[#allocation6] sm:$0x1f]  ;;  %v47_v9 = vld [vmem:[#allocation3 + $0x8] sm:$0xff]  ;;  %v46_v10 = vld [vmem:[#allocation3] sm:$0xff]  ;;  %vm358_vm2 = vcmask 39936   ;;  %vm441_vm3 = vcmask 57344  }
  0x29   :  { %75 = vmatpush1.xpose.msra.mxu1 %v53_v8  ;;  %138 = vmatprep.mubr.f32.mxu1 %v47_v9  ;;  %v50_v12 = vld [vmem:[#allocation3 + $0x20] sm:$0xff]  ;;  %v59_v13 = vld [vmem:[#allocation6 + $0x30] sm:$0x1f]  ;;  %v52_v14 = vld [vmem:[#allocation3 + $0x30] sm:$0xff] }
  0x2a   :  { %209 = vmatmul.mubr.f32.vlgmr.msra.gmra.mrb[0].mxu0 %v48_v4  ;;  %474 = vmatprep.subr.mxu1 %v568_v11  ;;  %v459_v17 = vld [vmem:[%s648_s2] ss:$0 sm:$0xff]  ;;  %s570_s2 = smov [#allocation8]  }
  0x2b   :  { %215 = vmatpush1.xpose.msra.mxu0 %v57_v5  ;;  %278 = vmatprep.mubr.f32.mxu0 %v51_v7  ;;  %v355_v23 = vld [vmem:[%s649_s3] sm:$0x1]  ;;  %s449_s21 = sshll.u32 %s570_s2, 4  ;;  %s450_s21 = int_to_ptr.vmem [resolvable:$true] %s449_s21 }
  0x2c   :  { %469 = vmatprep.subr.mxu0 %v568_v11  ;;  %139 = vmatmul.mubr.f32.vlgmr.msra.gmra.mrb[0].mxu1 %v46_v10  ;;  %s538_s3 = scalar_lea.vmem %s450_s21, 16  ;;  %s542_s22 = scalar_lea.vmem %s450_s21, 32 }
  0x2d   :  { %476 = vmatprep.mubr.msk.f32.mxu1 %vm569_vm0, %v568_v11  ;;  %p539_p2 = scmp.ne.s32.totalorder %s450_s21, %s538_s3  ;;  %p543_p3 = scmp.lt.s32.totalorder %s450_s21, %s450_s21 }
  0x2e   :  { %p544_p4 = scmp.lt.s32.totalorder %s542_s22, %s538_s3 }
  0x30   :  { %p545_p5 = por %p544_p4, %p543_p3 }
  0x32   :  { %279 = vmatmul.mubr.f32.vlgmr.msra.gmra.mrb[0].mxu0 %v50_v12  ;;  %p546_p6 = pnand %p545_p5, %p539_p2 }
  0x33   :  { %470 = vmatpush3.xpose.msk.msra.mxu0 %vm67_vm1, %v59_v13  ;;  %471 = vmatprep.mubr.msk.f32.mxu0 %vm569_vm0, %v568_v11 }
  0x3a   :  { %472 = vmatmul.mubr.msk.f32.vlgmr.msra.gmra.mrb[0].mxu0 %vm67_vm1, %v52_v14 }
  0xff   :  { %v140_v15 = vpop.f32.mrb[0].mxu1 }
 0x100   :  { %v142_v16 = vpop.f32.mrb[1].mxu1  ;;  %v141_v18 = vadd.f32 %v459_v17, %v140_v15 }
 0x10d   :  { %v350_v19 = vpop.f32.mrb[0].mxu0 }
 0x10e   :  { %v480_v20 = vadd.f32 %v350_v19, %v141_v18  ;;  %v473_v21 = vpop.f32.mrb[1].mxu0 }
 0x110   :  { %v354_v22 = vmax.f32 %v480_v20, 0.0 }
 0x112   :  { %475 = vmatpush3.xpose.msk.msra.mxu1 %vm358_vm2, %v354_v22 }
 0x115   :  { %477 = vmatmul.mubr.msk.f32.vlgmr.msra.gmra.mrb[2].mxu1 %vm358_vm2, %v355_v23 }
 0x1e8   :  { %v431_v25 = vpop.f32.mrb[2].mxu1 }
 0x1e9   :  { %v432_v26 = vadd.f32 %v431_v25, %v357_v24  ;;  %v478_v27 = vpop.f32.mrb[3].mxu1 }
 0x1eb   :  { %v464_v28 = vmul.f32 -1.442695, %v432_v26 }
 0x1ed   :  { %490 = vpow2.f32 %v464_v28 }
 0x1f7   :  { %v491_v29 = vpop.eup %490 }
 0x1f8   :  { %v438_v30 = vadd.f32 1.0, %v491_v29 }
 0x1fa   :  { %492 = vrcp.f32 %v438_v30 }
 0x204   :  { %v493_v31 = vpop.eup %492 }
 0x205   :  { %442 = vst.msk [vmem:[#allocation8] sm:$0x1] %vm441_vm3, %v493_v31 }
 0x206   :  { %549 = shalt.err (!%p546_p6)
}
 0x207   :  { %s550_s24 = scalar_lea.hbm %s651_s5, 16 }
 0x208   :  { %p551_p7 = scmp.ne.s32.totalorder %s651_s5, %s550_s24  ;;  %p554_p8 = scmp.lt.u32.totalorder %s550_s24, %s651_s5 }
 0x20a   :  { %p556_p9 = pnand %p554_p8, %p551_p7 }
 0x20c   :  { %559 = shalt.err (!%p556_p9)
}
 0x20d   :  { %452 = dma.vmem_to_hbm [thread:$0]  %s450_s21, 16, %s651_s5, [#allocation5]  }
 0x20e   :  { %564 = dma.done.wait [#allocation5], 16  }
 0x20f   :  { %565 = vsyncadd [#allocation5], 4294967280 }
 0x210   :  { %456 = vsyncpa [#allocation4], 1 }
 0x211   :  { %457 = vsyncpa [#allocation7], 1 }
 0x212   :  { %458 = vsyncpa [#allocation5], 1 }

</bundles_post_ra>
